<compile_context>
chip_gen: v6e
topology: v6e:2x2x1
jax: 0.10.0
libtpu: 0.0.40
codegen_flags: <defaults>
</compile_context>

<pallas_src>
import jax
import jax.numpy as jnp
from jax.experimental import pallas as pl
from jax.experimental.pallas import tpu as pltpu

_LANES = 128
_MAX_TILE_ROWS = 2048            # 2048 * 128 * 4B = 1 MiB per f32 buffer
_FAST_PATH_BYTES = 1 << 20       # below ~1 MiB: skip the custom call entirely


def _sin_exp_kernel(a_ref, x_ref, o_ref):
    # a_ref: (1,) f32 scalar in SMEM (one sreg load per tile)
    # x_ref / o_ref: (tile_rows, 128) VMEM tiles
    a = a_ref[0]
    y = a * jnp.sin(jnp.exp(x_ref[...].astype(jnp.float32)))
    o_ref[...] = y.astype(o_ref.dtype)


def test_model_forward(x: jax.Array, a: jax.Array, *, force_pallas: bool = False) -> jax.Array:
    """Computes y = a * sin(exp(x)), matching TestModel.forward."""
    orig_shape = x.shape
    orig_dtype = x.dtype
    n = x.size
    itemsize = jnp.dtype(orig_dtype).itemsize

    # --- Small-size fast path: fixed overhead dominates, let XLA fuse it. ---
    if not force_pallas and n * itemsize < _FAST_PATH_BYTES:
        a_f32 = jnp.asarray(a, jnp.float32)
        y = a_f32 * jnp.sin(jnp.exp(x.astype(jnp.float32)))
        return y.astype(orig_dtype)

    # --- Pallas path: lane-dense (rows, 128) view. ---
    x_flat = jnp.reshape(x, (-1,))
    rem = n % _LANES
    if rem:
        # Padded lanes compute sin(exp(0)) and are sliced off below.
        x_flat = jnp.pad(x_flat, (0, _LANES - rem))
    rows = x_flat.size // _LANES
    x2d = jnp.reshape(x_flat, (rows, _LANES))

    if rows <= _MAX_TILE_ROWS:
        # Single full-array block: no partial-store masking, minimal grid steps.
        tile_rows = rows
    else:
        # >= 2 grid steps so the "parallel" axis can shard across v7x's 2 TCs;
        # keep tile_rows a multiple of 32 (safe for future packed dtypes).
        half = -(-rows // 2)
        half = -(-half // 32) * 32
        tile_rows = min(_MAX_TILE_ROWS, half)
    num_blocks = pl.cdiv(rows, tile_rows)

    a_smem = jnp.reshape(jnp.asarray(a, jnp.float32), (1,))

    cost = pl.CostEstimate(
        flops=4 * n,               # mul + sin/exp polynomial bookkeeping
        transcendentals=2 * n,     # exp + sin
        bytes_accessed=2 * n * itemsize,
    )

    y2d = pl.pallas_call(
        _sin_exp_kernel,
        out_shape=jax.ShapeDtypeStruct((rows, _LANES), orig_dtype),
        grid=(num_blocks,),
        in_specs=[
            pl.BlockSpec(memory_space=pltpu.MemorySpace.SMEM),      # scalar a
            pl.BlockSpec((tile_rows, _LANES), lambda i: (i, 0)),    # x tile
        ],
        out_specs=pl.BlockSpec((tile_rows, _LANES), lambda i: (i, 0)),
        compiler_params=pltpu.CompilerParams(
            dimension_semantics=("parallel",),
        ),
        cost_estimate=cost,
    )(a_smem, x2d)

    y_flat = jnp.reshape(y2d, (-1,))
    if rem:
        y_flat = y_flat[:n]
    return jnp.reshape(y_flat, orig_shape)


if __name__ == "__main__":
    key = jax.random.PRNGKey(0)
    # Small NCHW-style input consistent with an elementwise forward pass.
    x = jax.random.normal(key, (2, 4, 16, 16), dtype=jnp.float32)
    # Parameter initialized as nn.Parameter(torch.tensor(1.0)).
    a = jnp.float32(1.0)

    y_ref = a * jnp.sin(jnp.exp(x))

    # 1) Exercise the Pallas kernel explicitly (bypass the small-size fast path).
    y_pallas = jax.block_until_ready(test_model_forward(x, a, force_pallas=True))
    assert jnp.allclose(y_pallas, y_ref, atol=1e-5, rtol=1e-5), "pallas path mismatch"

    # 2) Default path (fast path at this 8 KiB size — plain fused JAX).
    y_fast = jax.block_until_ready(test_model_forward(x, a))
    assert jnp.allclose(y_fast, y_ref, atol=1e-5, rtol=1e-5), "fast path mismatch"

    # 3) Non-lane-aligned shape through the padded Pallas path.
    x_odd = jax.random.normal(jax.random.PRNGKey(1), (3, 5, 7), dtype=jnp.float32)
    y_odd = jax.block_until_ready(test_model_forward(x_odd, a, force_pallas=True))
    assert jnp.allclose(y_odd, a * jnp.sin(jnp.exp(x_odd)), atol=1e-5, rtol=1e-5), \
        "padded path mismatch"

    print("KERNEL_OK")
</pallas_src>

<mosaic_0001>
module attributes {stable_mosaic.version = 11 : i64} {
  func.func @_sin_exp_kernel(%arg0: i32, %arg1: memref<1xf32, #tpu.memory_space<smem>>, %arg2: memref<16x128xf32, #tpu.memory_space<vmem>>, %arg3: memref<16x128xf32, #tpu.memory_space<vmem>>) attributes {dimension_semantics = [#tpu.dimension_semantics<parallel>], iteration_bounds = array<i64: 1>, scalar_prefetch = 0 : i64, scratch_operands = 0 : i64, tpu.core_type = #tpu.core_type<tc>, window_params = [{transform_indices = @transform_0, window_bounds = array<i64: 1>}, {transform_indices = @transform_1, window_bounds = array<i64: 16, 128>}, {transform_indices = @transform_2, window_bounds = array<i64: 16, 128>}]} {
    %c0 = arith.constant 0 : index
    %0 = memref.load %arg1[%c0] : memref<1xf32, #tpu.memory_space<smem>>
    %c0_0 = arith.constant 0 : index
    %c0_1 = arith.constant 0 : index
    %1 = vector.load %arg2[%c0_0, %c0_1] : memref<16x128xf32, #tpu.memory_space<vmem>>, vector<16x128xf32>
    %2 = math.exp %1 : vector<16x128xf32>
    %3 = math.sin %2 : vector<16x128xf32>
    %4 = vector.broadcast %0 : f32 to vector<16x128xf32>
    %5 = arith.mulf %4, %3 : vector<16x128xf32>
    %c0_2 = arith.constant 0 : index
    %c0_3 = arith.constant 0 : index
    %6 = vector.load %arg3[%c0_2, %c0_3] : memref<16x128xf32, #tpu.memory_space<vmem>>, vector<16x128xf32>
    tpu.vector_store %arg3[%c0_2, %c0_3], %5 {strides = array<i32>} : memref<16x128xf32, #tpu.memory_space<vmem>>, vector<16x128xf32>,
    return
  }
  func.func @transform_0(%arg0: i32) -> i32 {
    %c0_i32 = arith.constant 0 : i32
    %c0_i32_0 = arith.constant 0 : i32
    return %c0_i32 : i32
  }
  func.func @transform_1(%arg0: i32) -> (i32, i32) {
    %c0_i32 = arith.constant 0 : i32
    %c0_i32_0 = arith.constant 0 : i32
    return %arg0, %c0_i32 : i32, i32
  }
  func.func @transform_2(%arg0: i32) -> (i32, i32) {
    %c0_i32 = arith.constant 0 : i32
    %c0_i32_0 = arith.constant 0 : i32
    return %arg0, %c0_i32 : i32, i32
  }
}

</mosaic_0001>

<bundles_post_ra>
// kernel: tpu_custom_call.1
= control target key start
LH: loop header
LB: loop body
LE: loop exit
PB: predicated region body
PF: predicated region fallthrough
CT: control target
= control target key end

     0   :  { %8 = vsyncpa [#allocation4], 0  ;;  %s464_s0 = inlined_call_operand.<no memory space> [shape: f32[1], index: 0, kind: input, shape index: {}]   ;;  %s465_s1 = inlined_call_operand.hbm [shape: f32[16,128], index: 1, kind: input, shape index: {}]   ;;  %s466_s2 = inlined_call_operand.hbm [shape: f32[16,128], index: 2, kind: output, shape index: {}]  }
   0x1   :  { %9 = vsyncpa [#allocation5], 0  ;;  %s346_s9 = smov [#allocation3]  }
   0x2   :  { %s17_s10 = sshll.u32 %s346_s9, 4  ;;  %s18_s10 = int_to_ptr.vmem [resolvable:$true] %s17_s10 }
   0x3   :  { %s310_s11 = scalar_lea.vmem %s18_s10, 256  ;;  %p315_p1 = scmp.lt.s32.totalorder %s18_s10, %s18_s10 }
   0x4   :  { %p311_p0 = scmp.ne.s32.totalorder %s18_s10, %s310_s11  ;;  %p316_p2 = scmp.lt.s32.totalorder %s310_s11, %s310_s11 }
   0x6   :  { %p317_p3 = por %p316_p2, %p315_p1 }
   0x8   :  { %p318_p4 = pnand %p317_p3, %p311_p0 }
   0xa   :  { %321 = shalt.err (!%p318_p4)
}
   0xb   :  { %s347_s12 = smov 128   ;;  %s348_s13 = smov 8  }
   0xc   :  { %23 = dma.hbm_to_vmem [thread:$0]  %s465_s1, 256, %s18_s10, [#allocation4], %s347_s12, %s347_s12, %s348_s13  }
   0xd   :  { %342 = dma.done.wait [#allocation4], 256  }
   0xe   :  { %343 = vsyncadd [#allocation4], 4294967040  ;;  %v28_v0 = vld [vmem:[#allocation3] sm:$0xff]  ;;  %v29_v1 = vld [vmem:[#allocation3 + $0x8] sm:$0xff]  ;;  %v349_v28 = vmov 683565275  }
   0xf   :  { %v30_v2 = vmul.f32 1.442695, %v28_v0  ;;  %v32_v3 = vmul.f32 1.442695, %v29_v1  ;;  %v350_v30 = vmov 2475754826  }
  0x10   :  { %v351_v32 = vmov 2131351028   ;;  %v352_v34 = vmov 2102212464   ;;  %v353_v36 = vmov 920167782  }
  0x11   :  { %290 = vpow2.f32 %v30_v2  ;;  %v354_v44 = vmov 1326507024   ;;  %s355_s17 = smov [#allocation6]  }
  0x12   :  { %292 = vpow2.f32 %v32_v3  ;;  %s252_s18 = sshll.u32 %s355_s17, 4  ;;  %s253_s18 = int_to_ptr.vmem [resolvable:$true] %s252_s18 }
  0x13   :  { %p327_p6 = scmp.lt.s32.totalorder %s253_s18, %s253_s18 }
  0x1e   :  { %v377_v4 = vpop.eup %290 }
  0x1f   :  { %v379_v5 = vpop.eup %292  ;;  %v34_v6 = vand.u32 2147483647, %v377_v4  ;;  %v37_v7 = vand.u32 2139095040, %v377_v4  ;;  %vm36_vm14 = vcmp.lt.s32.totalorder %v377_v4, 0 }
  0x20   :  { %v138_v8 = vand.u32 2147483647, %v379_v5  ;;  %v141_v9 = vand.u32 2139095040, %v379_v5 }
  0x21   :  { %v38_v10 = vshrl.u32 %v37_v7, 23  ;;  %v41_v11 = vand.u32 8388607, %v34_v6  ;;  %vm440_vm15 = vcmp.le.f32.partialorder %v34_v6, 0.7853982 }
  0x22   :  { %v142_v12 = vshrl.u32 %v141_v9, 23  ;;  %v145_v13 = vand.u32 8388607, %v138_v8 }
  0x23   :  { %v264_v14 = vadd.s32 4294967169, %v38_v10  ;;  %v42_v17 = vor.u32 8388608, %v41_v11 }
  0x24   :  { %v268_v15 = vadd.s32 4294967169, %v142_v12  ;;  %v146_v18 = vor.u32 8388608, %v145_v13 }
  0x25   :  { %v44_v16 = vadd.s32 1, %v264_v14  ;;  %v389_v24 = vshll.u32 %v42_v17, 8 }
  0x26   :  { %v148_v19 = vadd.s32 1, %v268_v15  ;;  %v391_v26 = vshll.u32 %v146_v18, 8 }
  0x27   :  { %vm45_vm0 = vcmp.gt.s32.totalorder %v44_v16, 0 }
  0x28   :  { %v46_v20 = vsel %vm45_vm0, %v44_v16, 0  ;;  %vm149_vm1 = vcmp.gt.s32.totalorder %v148_v19, 0  ;;  %vm140_vm0 = vcmp.lt.s32.totalorder %v379_v5, 0 }
  0x29   :  { %v47_v21 = vshrl.u32 %v46_v20, 5  ;;  %v48_v22 = vand.u32 31, %v46_v20  ;;  %v150_v23 = vsel %vm149_vm1, %v148_v19, 0  ;;  %vm139_vm1 = vcmp.le.f32.partialorder %v138_v8, 0.7853982 }
  0x2a   :  { %v152_v25 = vand.u32 31, %v150_v23  ;;  %v393_v38 = vshrl.u32 %v150_v23, 5 }
  0x2b   :  { %v49_v27 = vsub.s32 32, %v48_v22  ;;  %v51_v29 = vshll.u32 %v349_v28, %v48_v22  ;;  %v54_v31 = vshll.u32 %v350_v30, %v48_v22  ;;  %v57_v33 = vshll.u32 %v351_v32, %v48_v22 }
  0x2c   :  { %v60_v35 = vshll.u32 %v352_v34, %v48_v22  ;;  %v63_v37 = vshll.u32 %v353_v36, %v48_v22  ;;  %vm66_vm2 = vcmp.lt.s32.totalorder %v47_v21, 1  ;;  %vm67_vm3 = vcmp.lt.s32.totalorder %v47_v21, 2 }
  0x2d   :  { %v50_v39 = vshrl.u32 %v349_v28, %v49_v27  ;;  %v52_v40 = vshrl.u32 %v350_v30, %v49_v27  ;;  %v55_v41 = vshrl.u32 %v351_v32, %v49_v27  ;;  %v58_v42 = vshrl.u32 %v352_v34, %v49_v27 }
  0x2e   :  { %v61_v43 = vshrl.u32 %v353_v36, %v49_v27  ;;  %v64_v45 = vshrl.u32 %v354_v44, %v49_v27  ;;  %vm69_vm4 = vcmp.lt.s32.totalorder %v47_v21, 4  ;;  %v153_v49 = vsub.s32 32, %v152_v25 }
  0x2f   :  { %v53_v46 = vor.u32 %v52_v40, %v51_v29  ;;  %v56_v47 = vor.u32 %v55_v41, %v54_v31  ;;  %v59_v48 = vor.u32 %v58_v42, %v57_v33  ;;  %vm68_vm5 = vcmp.lt.s32.totalorder %v47_v21, 3 }
  0x30   :  { %v62_v50 = vor.u32 %v61_v43, %v60_v35  ;;  %v65_v51 = vor.u32 %v64_v45, %v63_v37  ;;  %v155_v52 = vshll.u32 %v349_v28, %v152_v25  ;;  %v158_v60 = vshll.u32 %v350_v30, %v152_v25 }
  0x31   :  { %v70_v53 = vsel %vm66_vm2, %v50_v39, %v53_v46  ;;  %v71_v54 = vsel %vm69_vm4, %v59_v48, 2102212464  ;;  %v74_v55 = vsel %vm66_vm2, %v53_v46, %v56_v47  ;;  %v78_v56 = vsel %vm66_vm2, %v56_v47, %v59_v48 }
  0x32   :  { %v72_v57 = vsel %vm68_vm5, %v56_v47, %v71_v54  ;;  %v75_v58 = vsel %vm69_vm4, %v62_v50, 920167782  ;;  %v79_v59 = vsel %vm69_vm4, %v65_v51, 1326507024  ;;  %v154_v63 = vshrl.u32 %v349_v28, %v153_v49 }
  0x33   :  { %v76_v61 = vsel %vm68_vm5, %v59_v48, %v75_v58  ;;  %v80_v62 = vsel %vm68_vm5, %v62_v50, %v79_v59  ;;  %v156_v0 = vshrl.u32 %v350_v30, %v153_v49  ;;  %v73_v1 = vsel %vm67_vm3, %v70_v53, %v72_v57 }
  0x34   :  { %v77_v2 = vsel %vm67_vm3, %v74_v55, %v76_v61  ;;  %v81_v3 = vsel %vm67_vm3, %v78_v56, %v80_v62  ;;  %v159_v7 = vshrl.u32 %v351_v32, %v153_v49  ;;  %v161_v15 = vshll.u32 %v351_v32, %v152_v25 }
  0x35   :  { %v402_v9 = vmul.u32.u64.low %v389_v24, %v81_v3  ;;  %v403_v10 = vmul.u32.u64.high %v389_v24, %v81_v3, %v402_v9  ;;  %v406_v11 = vmul.u32.u64.low %v389_v24, %v77_v2  ;;  %v407_v12 = vmul.u32.u64.high %v389_v24, %v77_v2, %v406_v11 }
  0x36   :  { %v157_v13 = vor.u32 %v156_v0, %v155_v52  ;;  %v160_v14 = vor.u32 %v159_v7, %v158_v60  ;;  %v162_v16 = vshrl.u32 %v352_v34, %v153_v49  ;;  %v164_v17 = vshll.u32 %v352_v34, %v152_v25 }
  0x37   :  { %v165_v18 = vshrl.u32 %v353_v36, %v153_v49  ;;  %v167_v19 = vshll.u32 %v353_v36, %v152_v25  ;;  %v168_v20 = vshrl.u32 %v354_v44, %v153_v49  ;;  %v89_v21 = vmul.u32 %v389_v24, %v73_v1 }
  0x38   :  { %v163_v22 = vor.u32 %v162_v16, %v161_v15  ;;  %vm170_vm6 = vcmp.lt.s32.totalorder %v393_v38, 1  ;;  %vm171_vm7 = vcmp.lt.s32.totalorder %v393_v38, 2  ;;  %vm91_vm8 = vc.u32 %v403_v10, %v406_v11 }
  0x39   :  { %v92_v23 = vadd.s32 1, %v407_v12  ;;  %v166_v27 = vor.u32 %v165_v18, %v164_v17  ;;  %vm172_vm9 = vcmp.lt.s32.totalorder %v393_v38, 3  ;;  %v169_v28 = vor.u32 %v168_v20, %v167_v19 }
  0x3a   :  { %vm173_vm10 = vcmp.lt.s32.totalorder %v393_v38, 4  ;;  %v174_v29 = vsel %vm170_vm6, %v154_v63, %v157_v13  ;;  %v178_v25 = vsel %vm170_vm6, %v157_v13, %v160_v14  ;;  %v182_v32 = vsel %vm170_vm6, %v160_v14, %v163_v22 }
  0x3b   :  { %v93_v30 = vsel %vm91_vm8, %v92_v23, %v407_v12  ;;  %v175_v24 = vsel %vm173_vm10, %v163_v22, 2102212464  ;;  %v179_v31 = vsel %vm173_vm10, %v166_v27, 920167782  ;;  %v183_v36 = vsel %vm173_vm10, %v169_v28, 1326507024 }
  0x3c   :  { %v94_v33 = vadd.s32 %v93_v30, %v89_v21  ;;  %v176_v34 = vsel %vm172_vm9, %v160_v14, %v175_v24  ;;  %v180_v35 = vsel %vm172_vm9, %v163_v22, %v179_v31  ;;  %v184_v40 = vsel %vm172_vm9, %v166_v27, %v183_v36 }
  0x3d   :  { %v177_v37 = vsel %vm171_vm7, %v174_v29, %v176_v34  ;;  %v181_v39 = vsel %vm171_vm7, %v178_v25, %v180_v35  ;;  %v185_v42 = vsel %vm171_vm7, %v182_v32, %v184_v40  ;;  %v90_v61 = vadd.s32 %v406_v11, %v403_v10 }
  0x3e   :  { %v95_v41 = vadd.s32 536870912, %v94_v33  ;;  %v424_v43 = vmul.u32.u64.low %v391_v26, %v181_v39  ;;  %v425_v44 = vmul.u32.u64.high %v391_v26, %v181_v39, %v424_v43  ;;  %v193_v48 = vmul.u32 %v391_v26, %v177_v37 }
  0x3f   :  { %v428_v45 = vmul.u32.u64.low %v391_v26, %v185_v42  ;;  %v429_v46 = vmul.u32.u64.high %v391_v26, %v185_v42, %v428_v45  ;;  %vm126_vm5 = vweird.f32 %v377_v4  ;;  %vm230_vm9 = vweird.f32 %v379_v5 }
  0x40   :  { %v96_v47 = vshrl.u32 %v95_v41, 30  ;;  %v196_v50 = vadd.s32 1, %v425_v44 }
  0x41   :  { %vm195_vm11 = vc.u32 %v429_v46, %v424_v43  ;;  %v194_v17 = vadd.s32 %v424_v43, %v429_v46 }
  0x42   :  { %v97_v49 = vshll.u32 %v96_v47, 30  ;;  %v197_v38 = vsel %vm195_vm11, %v196_v50, %v425_v44  ;;  %v120_v22 = vsub.s32 4, %v96_v47 }
  0x43   :  { %v198_v52 = vadd.s32 %v197_v38, %v193_v48  ;;  %v242_v38 = vstv %s464_s0  ;;  %s322_s0 = scalar_lea.vmem %s253_s18, 256 }
  0x44   :  { %v98_v51 = vsub.s32 %v94_v33, %v97_v49  ;;  %v121_v31 = vsel %vm36_vm14, %v120_v22, %v96_v47  ;;  %p323_p5 = scmp.ne.s32.totalorder %s253_s18, %s322_s0  ;;  %p328_p7 = scmp.lt.s32.totalorder %s322_s0, %s322_s0 }
  0x45   :  { %v199_v54 = vadd.s32 536870912, %v198_v52  ;;  %v123_v6 = vsel %vm440_vm15, 0, %v121_v31 }
  0x46   :  { %v100_v53 = vsub.s32 0, %v98_v51  ;;  %v127_v39 = vadd.s32 3, %v123_v6  ;;  %p329_p8 = por %p328_p7, %p327_p6 }
  0x47   :  { %v200_v56 = vshrl.u32 %v199_v54, 30 }
  0x48   :  { %v265_v55 = vmin.u32 %v100_v53, %v98_v51  ;;  %v128_v44 = vand.u32 3, %v127_v39  ;;  %p330_p9 = pnand %p329_p8, %p323_p5 }
  0x49   :  { %v201_v58 = vshll.u32 %v200_v56, 30  ;;  %v224_v37 = vsub.s32 4, %v200_v56 }
  0x4a   :  { %v102_v57 = vclz %v265_v55  ;;  %vm133_vm2 = vcmp.eq.s32.totalorder %v128_v44, 2  ;;  %vm130_vm3 = vcmp.eq.s32.totalorder %v128_v44, 0  ;;  %vm129_vm4 = vcmp.lt.s32.totalorder %v128_v44, 2 }
  0x4b   :  { %v202_v60 = vsub.s32 %v198_v52, %v201_v58  ;;  %v225_v42 = vsel %vm140_vm0, %v224_v37, %v200_v56 }
  0x4c   :  { %v266_v59 = vadd.s32 4294967294, %v102_v57  ;;  %v227_v45 = vsel %vm139_vm1, 0, %v225_v42 }
  0x4d   :  { %v204_v62 = vsub.s32 0, %v202_v60  ;;  %v231_v49 = vadd.s32 3, %v227_v45 }
  0x4e   :  { %vm267_vm12 = vcmp.lt.s32.totalorder %v266_v59, 0 }
  0x4f   :  { %v105_v26 = vsel %vm267_vm12, 0, %v266_v59  ;;  %v269_v2 = vmin.u32 %v204_v62, %v202_v60  ;;  %v232_v53 = vand.u32 3, %v231_v49 }
  0x50   :  { %v106_v63 = vsub.s32 32, %v105_v26  ;;  %v107_v0 = vshll.u32 %v98_v51, %v105_v26  ;;  %v110_v1 = vsub.s32 4294967266, %v105_v26 }
  0x51   :  { %v206_v9 = vclz %v269_v2  ;;  %vm237_vm6 = vcmp.eq.s32.totalorder %v232_v53, 2  ;;  %vm234_vm7 = vcmp.eq.s32.totalorder %v232_v53, 0  ;;  %vm233_vm8 = vcmp.lt.s32.totalorder %v232_v53, 2 }
  0x52   :  { %v108_v3 = vshrl.u32 %v90_v61, %v106_v63  ;;  %v111_v7 = vadd.s32 127, %v110_v1 }
  0x53   :  { %v270_v14 = vadd.s32 4294967294, %v206_v9 }
  0x54   :  { %v109_v12 = vor.u32 %v108_v3, %v107_v0  ;;  %v112_v13 = vshll.u32 %v111_v7, 23 }
  0x55   :  { %vm271_vm13 = vcmp.lt.s32.totalorder %v270_v14, 0 }
  0x56   :  { %v113_v15 = vor.u32 4788187, %v112_v13  ;;  %v116_v16 = vcvt.s32.f32 %v109_v12  ;;  %v209_v10 = vsel %vm271_vm13, 0, %v270_v14 }
  0x57   :  { %v210_v11 = vsub.s32 32, %v209_v10  ;;  %v211_v19 = vshll.u32 %v202_v60, %v209_v10  ;;  %v214_v20 = vsub.s32 4294967266, %v209_v10 }
  0x58   :  { %v114_v18 = vand.u32 2147483647, %v113_v15 }
  0x59   :  { %v212_v23 = vshrl.u32 %v194_v17, %v210_v11  ;;  %v215_v27 = vadd.s32 127, %v214_v20 }
  0x5a   :  { %v117_v21 = vmul.f32 %v116_v16, %v114_v18 }
  0x5b   :  { %v213_v25 = vor.u32 %v212_v23, %v211_v19  ;;  %v216_v30 = vshll.u32 %v215_v27, 23 }
  0x5c   :  { %v118_v29 = vxor.u32 2147483648, %v117_v21 }
  0x5d   :  { %v217_v33 = vor.u32 4788187, %v216_v30  ;;  %v220_v34 = vcvt.s32.f32 %v213_v25 }
  0x5e   :  { %v119_v24 = vsel %vm36_vm14, %v118_v29, %v117_v21 }
  0x5f   :  { %v122_v32 = vsel %vm440_vm15, %v377_v4, %v119_v24  ;;  %v218_v35 = vand.u32 2147483647, %v217_v33 }
  0x60   :  { %294 = vcosq.f32 %v122_v32 }
  0x61   :  { %296 = vsinq.f32 %v122_v32  ;;  %v221_v36 = vmul.f32 %v220_v34, %v218_v35 }
  0x63   :  { %v222_v40 = vxor.u32 2147483648, %v221_v36 }
  0x65   :  { %v223_v41 = vsel %vm140_vm0, %v222_v40, %v221_v36 }
  0x66   :  { %v226_v43 = vsel %vm139_vm1, %v379_v5, %v223_v41 }
  0x67   :  { %298 = vcosq.f32 %v226_v43 }
  0x68   :  { %300 = vsinq.f32 %v226_v43 }
  0x6d   :  { %v295_v46 = vpop.eup %294 }
  0x6e   :  { %v297_v47 = vpop.eup %296  ;;  %v134_v48 = vxor.u32 2147483648, %v295_v46 }
  0x6f   :  { %v131_v50 = vxor.u32 2147483648, %v297_v47 }
  0x70   :  { %v135_v8 = vsel %vm133_vm2, %v134_v48, %v297_v47 }
  0x71   :  { %v132_v51 = vsel %vm130_vm3, %v295_v46, %v131_v50 }
  0x72   :  { %v136_v52 = vsel %vm129_vm4, %v132_v51, %v135_v8 }
  0x73   :  { %v137_v54 = vsel %vm126_vm5, nan, %v136_v52 }
  0x74   :  { %v243_v55 = vmul.f32 %v242_v38, %v137_v54  ;;  %v299_v56 = vpop.eup %298 }
  0x75   :  { %v301_v57 = vpop.eup %300  ;;  %v238_v58 = vxor.u32 2147483648, %v299_v56 }
  0x76   :  { %245 = vst [vmem:[#allocation6] sm:$0xff] %v243_v55  ;;  %v235_v59 = vxor.u32 2147483648, %v301_v57 }
  0x77   :  { %v239_v4 = vsel %vm237_vm6, %v238_v58, %v301_v57 }
  0x78   :  { %v236_v60 = vsel %vm234_vm7, %v299_v56, %v235_v59 }
  0x79   :  { %v240_v61 = vsel %vm233_vm8, %v236_v60, %v239_v4 }
  0x7a   :  { %v241_v26 = vsel %vm230_vm9, nan, %v240_v61 }
  0x7b   :  { %v244_v62 = vmul.f32 %v242_v38, %v241_v26 }
  0x7d   :  { %246 = vst [vmem:[#allocation6 + $0x8] sm:$0xff] %v244_v62 }
  0x7e   :  { %333 = shalt.err (!%p330_p9)
}
  0x7f   :  { %258 = dma.vmem_to_hbm [thread:$0]  %s253_s18, 256, %s466_s2, [#allocation5], %s347_s12, %s347_s12, %s348_s13  }
  0x80   :  { %344 = dma.done.wait [#allocation5], 256  }
  0x81   :  { %345 = vsyncadd [#allocation5], 4294967040 }
  0x82   :  { %262 = vsyncpa [#allocation4], 1 }
  0x83   :  { %263 = vsyncpa [#allocation5], 1 }

</bundles_post_ra>
